<compile_context>
chip_gen: v7x
topology: tpu7x:2x2x1
jax: 0.10.0
libtpu: 0.0.40
codegen_flags: <defaults>
</compile_context>

<pallas_src>
import jax
import jax.numpy as jnp
from jax.experimental import pallas as pl
from jax.experimental.pallas import tpu as pltpu

PACK = 8  # batch rows packed per sublane row (zero-copy reshape factor)


def _round_up(x, m):
    return ((x + m - 1) // m) * m


def fcqsa_kernel(xp_ref, up_ref, w1x_ref, w1u_ref, b1_ref, w2_ref, b2_ref,
                 w3_ref, b3_ref, o_ref):
    cdt = w1x_ref.dtype
    # In-kernel cast (VPU has slack); avoids a wrapper-side HBM convert pass.
    x = xp_ref[...].astype(cdt)                     # [T, PACK*in_dim]
    u = up_ref[...].astype(cdt)                     # [T, PACK*out_dim]
    # Layer 1: block-diagonal weights -> per-packed-slot x@W1x + u@W1u (concat
    # eliminated), f32 accumulation, dense lanes.
    h = jnp.dot(x, w1x_ref[...], preferred_element_type=jnp.float32)
    h = h + jnp.dot(u, w1u_ref[...], preferred_element_type=jnp.float32)
    h = jnp.maximum(h + b1_ref[...], 0.0)           # [T, PACK*h0] f32
    # Layer 2.
    h = jnp.dot(h.astype(cdt), w2_ref[...], preferred_element_type=jnp.float32)
    h = jnp.maximum(h + b2_ref[...], 0.0)           # [T, PACK*h1] f32
    # Output layer: block-diag [PACK*h1, PACK] -> one q per packed batch slot.
    q = jnp.dot(h.astype(cdt), w3_ref[...], preferred_element_type=jnp.float32)
    o_ref[...] = (q + b3_ref[...]).astype(o_ref.dtype)   # [T, PACK]


def fcqsa_forward(state, action, params, *, tile_b=32768,
                  compute_dtype=jnp.bfloat16,
                  vmem_limit_bytes=48 * 1024 * 1024):
    """state: [B, input_dim], action: [B, output_dim] -> q: [B, 1] (float32)."""
    w1x, w1u, b1, w2, b2, w3, b3 = params
    B, in_dim = state.shape
    out_dim = action.shape[1]
    h0 = w1x.shape[1]
    h1 = w2.shape[1]

    # --- batch-in-lanes packing (zero-copy reshapes; pad only if B % 8 != 0) ---
    B8 = _round_up(B, PACK)
    if B8 != B:
        state = jnp.pad(state, ((0, B8 - B), (0, 0)))
        action = jnp.pad(action, ((0, B8 - B), (0, 0)))
    R = B8 // PACK
    xp = state.reshape(R, PACK * in_dim)      # row-major split -> no data movement
    up = action.reshape(R, PACK * out_dim)

    # Block-diagonal / lane-tiled weights (tiny, built once per call).
    eye = jnp.eye(PACK, dtype=jnp.float32)
    w1x_bd = jnp.kron(eye, w1x).astype(compute_dtype)    # [PACK*in_dim, PACK*h0]
    w1u_bd = jnp.kron(eye, w1u).astype(compute_dtype)    # [PACK*out_dim, PACK*h0]
    w2_bd = jnp.kron(eye, w2).astype(compute_dtype)      # [PACK*h0, PACK*h1]
    w3_bd = jnp.kron(eye, w3).astype(compute_dtype)      # [PACK*h1, PACK]
    b1_t = jnp.tile(b1, (1, PACK))                       # f32 [1, PACK*h0]
    b2_t = jnp.tile(b2, (1, PACK))                       # f32 [1, PACK*h1]
    b3_t = jnp.tile(b3, (1, PACK))                       # f32 [1, PACK]

    # --- batch tiling: cdiv grid, partial last block masked by Pallas ---
    req = max(1, tile_b // PACK)
    if req >= R:
        tile_rows = R                      # single block == full array dim (ok)
    else:
        tile_rows = max(8, (req // 8) * 8)  # sublane rule for non-full blocks
        tile_rows = min(tile_rows, R)
    grid = (pl.cdiv(R, tile_rows),)

    w_bytes = sum(int(a.size) * a.dtype.itemsize
                  for a in (w1x_bd, w1u_bd, b1_t, w2_bd, b2_t, w3_bd, b3_t))
    cost = pl.CostEstimate(
        flops=2 * B8 * (in_dim * h0 + out_dim * h0 + h0 * h1 + h1),
        transcendentals=0,
        bytes_accessed=B8 * (in_dim + out_dim + 1) * 4 + w_bytes,
    )

    def resident(a):
        # Constant block index -> DMA'd once, stays resident across grid steps.
        return pl.BlockSpec(a.shape, lambda i: (0, 0))

    out = pl.pallas_call(
        fcqsa_kernel,
        out_shape=jax.ShapeDtypeStruct((R, PACK), jnp.float32),
        grid=grid,
        in_specs=[
            pl.BlockSpec((tile_rows, PACK * in_dim), lambda i: (i, 0)),   # state
            pl.BlockSpec((tile_rows, PACK * out_dim), lambda i: (i, 0)),  # action
            resident(w1x_bd), resident(w1u_bd), resident(b1_t),
            resident(w2_bd), resident(b2_t),
            resident(w3_bd), resident(b3_t),
        ],
        out_specs=pl.BlockSpec((tile_rows, PACK), lambda i: (i, 0)),
        compiler_params=pltpu.CompilerParams(
            dimension_semantics=("parallel",),
            vmem_limit_bytes=vmem_limit_bytes),
        cost_estimate=cost,
    )(xp, up, w1x_bd, w1u_bd, b1_t, w2_bd, b2_t, w3_bd, b3_t)

    # [R, PACK] row-major is exactly q for batch rows 0..B8-1; slice the pad off.
    return out.reshape(B8, 1)[:B]


def init_params(key, input_dim, output_dim, hidden_dims=(32, 32)):
    """PyTorch-style Linear init: U[-1/sqrt(fan_in), 1/sqrt(fan_in)].
    Layout: W as [in_features, out_features]; W1 split into state/action halves."""
    assert len(hidden_dims) == 2, "kernel is specialized to hidden_dims=(h0, h1)"
    fan_ins = [input_dim + output_dim] + list(hidden_dims)
    fan_outs = list(hidden_dims) + [1]
    raw = []
    for fi, fo in zip(fan_ins, fan_outs):
        key, kw, kb = jax.random.split(key, 3)
        bound = 1.0 / (fi ** 0.5)
        w = jax.random.uniform(kw, (fi, fo), jnp.float32, -bound, bound)
        b = jax.random.uniform(kb, (1, fo), jnp.float32, -bound, bound)
        raw.append((w, b))
    (w1, b1), (w2, b2), (w3, b3) = raw
    return (w1[:input_dim], w1[input_dim:], b1, w2, b2, w3, b3)


def fcqsa_reference(state, action, params):
    """Pure-JAX float32 reference matching the PyTorch module."""
    w1x, w1u, b1, w2, b2, w3, b3 = params
    h = jax.nn.relu(state @ w1x + action @ w1u + b1)   # == concat(x,u) @ W1 + b1
    h = jax.nn.relu(h @ w2 + b2)
    return h @ w3 + b3


if __name__ == "__main__":
    key = jax.random.PRNGKey(0)
    k_s, k_a, k_p, k_s2, k_a2 = jax.random.split(key, 5)

    batch, input_dim, output_dim = 2, 16, 4
    params = init_params(k_p, input_dim, output_dim, hidden_dims=(32, 32))

    state = jax.random.normal(k_s, (batch, input_dim), jnp.float32)
    action = jax.random.normal(k_a, (batch, output_dim), jnp.float32)
    q_ref = fcqsa_reference(state, action, params)

    # float32 path: tight match to the reference.
    q_f32 = jax.block_until_ready(
        fcqsa_forward(state, action, params, compute_dtype=jnp.float32))
    assert q_f32.shape == (batch, 1)
    assert jnp.allclose(q_f32, q_ref, atol=1e-5, rtol=1e-5), (q_f32, q_ref)

    # default bf16 in-kernel compute path: f32 accumulation, looser tolerance.
    q_bf16 = jax.block_until_ready(fcqsa_forward(state, action, params))
    assert q_bf16.shape == (batch, 1)
    assert jnp.allclose(q_bf16, q_ref, atol=5e-2, rtol=5e-2), (q_bf16, q_ref)

    # multi-tile + ragged batch: 300 rows -> 38 packed rows, tile_rows=16,
    # grid of 3 with a masked partial last block (cdiv-grid tail handling).
    b_big = 300
    state2 = jax.random.normal(k_s2, (b_big, input_dim), jnp.float32)
    action2 = jax.random.normal(k_a2, (b_big, output_dim), jnp.float32)
    q2 = jax.block_until_ready(
        fcqsa_forward(state2, action2, params, tile_b=128,
                      compute_dtype=jnp.float32))
    q2_ref = fcqsa_reference(state2, action2, params)
    assert q2.shape == (b_big, 1)
    assert jnp.allclose(q2, q2_ref, atol=1e-5, rtol=1e-5), "multi-tile mismatch"

    print("KERNEL_OK")
</pallas_src>

<mosaic_0001>
module attributes {stable_mosaic.version = 11 : i64} {
  func.func @fcqsa_kernel(%arg0: i32, %arg1: memref<1x128xf32, #tpu.memory_space<vmem>>, %arg2: memref<1x32xf32, #tpu.memory_space<vmem>>, %arg3: memref<128x256xf32, #tpu.memory_space<vmem>>, %arg4: memref<32x256xf32, #tpu.memory_space<vmem>>, %arg5: memref<1x256xf32, #tpu.memory_space<vmem>>, %arg6: memref<256x256xf32, #tpu.memory_space<vmem>>, %arg7: memref<1x256xf32, #tpu.memory_space<vmem>>, %arg8: memref<256x8xf32, #tpu.memory_space<vmem>>, %arg9: memref<1x8xf32, #tpu.memory_space<vmem>>, %arg10: memref<1x8xf32, #tpu.memory_space<vmem>>) attributes {dimension_semantics = [#tpu.dimension_semantics<parallel>], iteration_bounds = array<i64: 1>, scalar_prefetch = 0 : i64, scratch_operands = 0 : i64, tpu.core_type = #tpu.core_type<tc>, window_params = [{transform_indices = @transform_0, window_bounds = array<i64: 1, 128>}, {transform_indices = @transform_1, window_bounds = array<i64: 1, 32>}, {pipeline_mode = #tpu.pipeline_mode<synchronous>, transform_indices = @transform_2, window_bounds = array<i64: 128, 256>}, {pipeline_mode = #tpu.pipeline_mode<synchronous>, transform_indices = @transform_3, window_bounds = array<i64: 32, 256>}, {pipeline_mode = #tpu.pipeline_mode<synchronous>, transform_indices = @transform_4, window_bounds = array<i64: 1, 256>}, {pipeline_mode = #tpu.pipeline_mode<synchronous>, transform_indices = @transform_5, window_bounds = array<i64: 256, 256>}, {pipeline_mode = #tpu.pipeline_mode<synchronous>, transform_indices = @transform_6, window_bounds = array<i64: 1, 256>}, {pipeline_mode = #tpu.pipeline_mode<synchronous>, transform_indices = @transform_7, window_bounds = array<i64: 256, 8>}, {pipeline_mode = #tpu.pipeline_mode<synchronous>, transform_indices = @transform_8, window_bounds = array<i64: 1, 8>}, {transform_indices = @transform_9, window_bounds = array<i64: 1, 8>}]} {
    %c0 = arith.constant 0 : index
    %c0_0 = arith.constant 0 : index
    %0 = vector.load %arg1[%c0, %c0_0] : memref<1x128xf32, #tpu.memory_space<vmem>>, vector<1x128xf32>
    %c0_1 = arith.constant 0 : index
    %c0_2 = arith.constant 0 : index
    %1 = vector.load %arg2[%c0_1, %c0_2] : memref<1x32xf32, #tpu.memory_space<vmem>>, vector<1x32xf32>
    %c0_3 = arith.constant 0 : index
    %c0_4 = arith.constant 0 : index
    %2 = vector.load %arg3[%c0_3, %c0_4] : memref<128x256xf32, #tpu.memory_space<vmem>>, vector<128x256xf32>
    %cst = arith.constant dense<0.000000e+00> : vector<1x256xf32>
    %3 = tpu.matmul %0, %2, %cst {dimension_numbers = #tpu.dot_dimension_numbers<[1], [0], [0], [1], [0, 0, 1, 1], [], []>} : vector<1x128xf32>, vector<128x256xf32>, vector<1x256xf32> -> vector<1x256xf32>
    %c0_5 = arith.constant 0 : index
    %c0_6 = arith.constant 0 : index
    %4 = vector.load %arg4[%c0_5, %c0_6] : memref<32x256xf32, #tpu.memory_space<vmem>>, vector<32x256xf32>
    %cst_7 = arith.constant dense<0.000000e+00> : vector<1x256xf32>
    %5 = tpu.matmul %1, %4, %cst_7 {dimension_numbers = #tpu.dot_dimension_numbers<[1], [0], [0], [1], [0, 0, 1, 1], [], []>} : vector<1x32xf32>, vector<32x256xf32>, vector<1x256xf32> -> vector<1x256xf32>
    %6 = arith.addf %3, %5 : vector<1x256xf32>
    %c0_8 = arith.constant 0 : index
    %c0_9 = arith.constant 0 : index
    %7 = vector.load %arg5[%c0_8, %c0_9] : memref<1x256xf32, #tpu.memory_space<vmem>>, vector<1x256xf32>
    %8 = arith.addf %6, %7 : vector<1x256xf32>
    %cst_10 = arith.constant 0.000000e+00 : f32
    %9 = vector.broadcast %cst_10 : f32 to vector<1x256xf32>
    %10 = arith.maximumf %8, %9 : vector<1x256xf32>
    %c0_11 = arith.constant 0 : index
    %c0_12 = arith.constant 0 : index
    %11 = vector.load %arg6[%c0_11, %c0_12] : memref<256x256xf32, #tpu.memory_space<vmem>>, vector<256x256xf32>
    %cst_13 = arith.constant dense<0.000000e+00> : vector<1x256xf32>
    %12 = tpu.matmul %10, %11, %cst_13 {dimension_numbers = #tpu.dot_dimension_numbers<[1], [0], [0], [1], [0, 0, 1, 1], [], []>} : vector<1x256xf32>, vector<256x256xf32>, vector<1x256xf32> -> vector<1x256xf32>
    %c0_14 = arith.constant 0 : index
    %c0_15 = arith.constant 0 : index
    %13 = vector.load %arg7[%c0_14, %c0_15] : memref<1x256xf32, #tpu.memory_space<vmem>>, vector<1x256xf32>
    %14 = arith.addf %12, %13 : vector<1x256xf32>
    %cst_16 = arith.constant 0.000000e+00 : f32
    %15 = vector.broadcast %cst_16 : f32 to vector<1x256xf32>
    %16 = arith.maximumf %14, %15 : vector<1x256xf32>
    %c0_17 = arith.constant 0 : index
    %c0_18 = arith.constant 0 : index
    %17 = vector.load %arg8[%c0_17, %c0_18] : memref<256x8xf32, #tpu.memory_space<vmem>>, vector<256x8xf32>
    %cst_19 = arith.constant dense<0.000000e+00> : vector<1x8xf32>
    %18 = tpu.matmul %16, %17, %cst_19 {dimension_numbers = #tpu.dot_dimension_numbers<[1], [0], [0], [1], [0, 0, 1, 1], [], []>} : vector<1x256xf32>, vector<256x8xf32>, vector<1x8xf32> -> vector<1x8xf32>
    %c0_20 = arith.constant 0 : index
    %c0_21 = arith.constant 0 : index
    %19 = vector.load %arg9[%c0_20, %c0_21] : memref<1x8xf32, #tpu.memory_space<vmem>>, vector<1x8xf32>
    %20 = arith.addf %18, %19 : vector<1x8xf32>
    %c0_22 = arith.constant 0 : index
    %c0_23 = arith.constant 0 : index
    %21 = vector.load %arg10[%c0_22, %c0_23] : memref<1x8xf32, #tpu.memory_space<vmem>>, vector<1x8xf32>
    tpu.vector_store %arg10[%c0_22, %c0_23], %20 {strides = array<i32>} : memref<1x8xf32, #tpu.memory_space<vmem>>, vector<1x8xf32>,
    return
  }
  func.func @transform_0(%arg0: i32) -> (i32, i32) {
    %c0_i32 = arith.constant 0 : i32
    %c0_i32_0 = arith.constant 0 : i32
    return %arg0, %c0_i32 : i32, i32
  }
  func.func @transform_1(%arg0: i32) -> (i32, i32) {
    %c0_i32 = arith.constant 0 : i32
    %c0_i32_0 = arith.constant 0 : i32
    return %arg0, %c0_i32 : i32, i32
  }
  func.func @transform_2(%arg0: i32) -> (i32, i32) {
    %c0_i32 = arith.constant 0 : i32
    %c0_i32_0 = arith.constant 0 : i32
    %c0_i32_1 = arith.constant 0 : i32
    return %c0_i32, %c0_i32_0 : i32, i32
  }
  func.func @transform_3(%arg0: i32) -> (i32, i32) {
    %c0_i32 = arith.constant 0 : i32
    %c0_i32_0 = arith.constant 0 : i32
    %c0_i32_1 = arith.constant 0 : i32
    return %c0_i32, %c0_i32_0 : i32, i32
  }
  func.func @transform_4(%arg0: i32) -> (i32, i32) {
    %c0_i32 = arith.constant 0 : i32
    %c0_i32_0 = arith.constant 0 : i32
    %c0_i32_1 = arith.constant 0 : i32
    return %c0_i32, %c0_i32_0 : i32, i32
  }
  func.func @transform_5(%arg0: i32) -> (i32, i32) {
    %c0_i32 = arith.constant 0 : i32
    %c0_i32_0 = arith.constant 0 : i32
    %c0_i32_1 = arith.constant 0 : i32
    return %c0_i32, %c0_i32_0 : i32, i32
  }
  func.func @transform_6(%arg0: i32) -> (i32, i32) {
    %c0_i32 = arith.constant 0 : i32
    %c0_i32_0 = arith.constant 0 : i32
    %c0_i32_1 = arith.constant 0 : i32
    return %c0_i32, %c0_i32_0 : i32, i32
  }
  func.func @transform_7(%arg0: i32) -> (i32, i32) {
    %c0_i32 = arith.constant 0 : i32
    %c0_i32_0 = arith.constant 0 : i32
    %c0_i32_1 = arith.constant 0 : i32
    return %c0_i32, %c0_i32_0 : i32, i32
  }
  func.func @transform_8(%arg0: i32) -> (i32, i32) {
    %c0_i32 = arith.constant 0 : i32
    %c0_i32_0 = arith.constant 0 : i32
    %c0_i32_1 = arith.constant 0 : i32
    return %c0_i32, %c0_i32_0 : i32, i32
  }
  func.func @transform_9(%arg0: i32) -> (i32, i32) {
    %c0_i32 = arith.constant 0 : i32
    %c0_i32_0 = arith.constant 0 : i32
    return %arg0, %c0_i32 : i32, i32
  }
}

</mosaic_0001>

<bundles_post_ra>
// kernel: tpu_custom_call.1
= control target key start
LH: loop header
LB: loop body
LE: loop exit
PB: predicated region body
PF: predicated region fallthrough
CT: control target
= control target key end

     0   :  { %14 = vsyncpa [#allocation3], 0  ;;  %s1086_s0 = inlined_call_operand.vmem [shape: f32[1,128], index: 0, kind: input, shape index: {}]   ;;  %s1087_s1 = inlined_call_operand.vmem [shape: f32[1,32], index: 1, kind: input, shape index: {}]   ;;  %s1088_s2 = inlined_call_operand.vmem [shape: f32[128,256], index: 2, kind: input, shape index: {}]   ;;  %s1089_s3 = inlined_call_operand.hbm [shape: f32[32,256], index: 3, kind: input, shape index: {}]   ;;  %s1090_s4 = inlined_call_operand.vmem [shape: f32[1,256], index: 4, kind: input, shape index: {}]   ;;  %s1091_s5 = inlined_call_operand.hbm [shape: f32[256,256], index: 5, kind: input, shape index: {}]   ;;  %s1092_s6 = inlined_call_operand.vmem [shape: f32[1,256], index: 6, kind: input, shape index: {}]   ;;  %s1093_s7 = inlined_call_operand.vmem [shape: f32[256,8], index: 7, kind: input, shape index: {}]   ;;  %s1094_s8 = inlined_call_operand.vmem [shape: f32[1,8], index: 8, kind: input, shape index: {}]   ;;  %s1095_s9 = inlined_call_operand.hbm [shape: f32[1,8], index: 9, kind: output, shape index: {}]  }
   0x1   :  { %15 = vsyncpa [#allocation6], 0 }
   0x2   :  { %16 = vsyncpa [#allocation4], 0  ;;  %s787_s30 = smov [#allocation2]   ;;  %s715_s13 = scalar_lea.hbm %s1089_s3, 1024 }
   0x3   :  { %s28_s10 = sshll.u32 %s787_s30, 4  ;;  %p716_p0 = scmp.ne.s32.totalorder %s1089_s3, %s715_s13  ;;  %s29_s10 = int_to_ptr.vmem [resolvable:$true] %s28_s10 }
   0x4   :  { %p719_p1 = scmp.lt.u32.totalorder %s715_s13, %s1089_s3 }
   0x6   :  { %p721_p2 = pnand %p719_p1, %p716_p0 }
   0x8   :  { %724 = shalt.err (!%p721_p2)
}
   0x9   :  { %s725_s18 = scalar_lea.vmem %s29_s10, 1024  ;;  %p730_p4 = scmp.lt.s32.totalorder %s29_s10, %s29_s10 }
   0xa   :  { %p726_p3 = scmp.ne.s32.totalorder %s29_s10, %s725_s18  ;;  %p731_p5 = scmp.lt.s32.totalorder %s725_s18, %s725_s18 }
   0xc   :  { %p732_p6 = por %p731_p5, %p730_p4 }
   0xe   :  { %p733_p7 = pnand %p732_p6, %p726_p3 }
  0x10   :  { %736 = shalt.err (!%p733_p7)
}
  0x11   :  { %s788_s19 = smov 256   ;;  %s789_s20 = smov 16  }
  0x12   :  { %34 = dma.hbm_to_vmem [thread:$0]  %s1089_s3, 1024, %s29_s10, [#allocation3], %s788_s19, %s788_s19, %s789_s20  }
  0x13   :  { %s790_s23 = smov [#allocation5]   ;;  %s737_s27 = scalar_lea.hbm %s1091_s5, 8192 }
  0x14   :  { %s42_s24 = sshll.u32 %s790_s23, 4  ;;  %p738_p8 = scmp.ne.s32.totalorder %s1091_s5, %s737_s27  ;;  %s43_s24 = int_to_ptr.vmem [resolvable:$true] %s42_s24 }
  0x15   :  { %p741_p9 = scmp.lt.u32.totalorder %s737_s27, %s1091_s5 }
  0x17   :  { %p743_p10 = pnand %p741_p9, %p738_p8 }
  0x19   :  { %746 = shalt.err (!%p743_p10)
}
  0x1a   :  { %s747_s12 = scalar_lea.vmem %s43_s24, 8192  ;;  %p752_p12 = scmp.lt.s32.totalorder %s43_s24, %s43_s24 }
  0x1b   :  { %p748_p11 = scmp.ne.s32.totalorder %s43_s24, %s747_s12  ;;  %p753_p13 = scmp.lt.s32.totalorder %s747_s12, %s747_s12 }
  0x1d   :  { %p754_p0 = por %p753_p13, %p752_p12 }
  0x1f   :  { %p755_p1 = pnand %p754_p0, %p748_p11 }
  0x21   :  { %758 = shalt.err (!%p755_p1)
}
  0x22   :  { %48 = dma.hbm_to_vmem [thread:$0]  %s1091_s5, 8192, %s43_s24, [#allocation6], %s788_s19, %s788_s19, %s789_s20  }
  0x23   :  { %781 = dma.done.wait [#allocation3], 1024  }
  0x24   :  { %782 = vsyncadd [#allocation3], 4294966272 }
  0x25   :  { %783 = dma.done.wait [#allocation6], 8192  }
  0x26   :  { %784 = vsyncadd [#allocation6], 4294959104  ;;  %v791_v0 = vmov 0.0   ;;  %v96_v1 = vld [vmem:[#allocation2 + $0x8] sm:$0xff]  ;;  %v98_v2 = vld [vmem:[#allocation2 + $0x18] sm:$0xff]  ;;  %vm103_vm0 = vcmask 261120  }
  0x27   :  { %171 = vmatprep.mubr.f32.mxu0 %v791_v0  ;;  %v95_v3 = vld [vmem:[#allocation2] sm:$0xff]  ;;  %v571_v4 = vpack.c.bf16 %v98_v2, %v96_v1  ;;  %v97_v5 = vld [vmem:[#allocation2 + $0x10] sm:$0xff]  ;;  %v100_v6 = vld [vmem:[#allocation2 + $0x28] sm:$0xff]  ;;  %s792_s22 = smov [#allocation7]   ;;  %vm517_vm1 = vcmask 57344  }
  0x28   :  { %v102_v7 = vld [vmem:[#allocation2 + $0x38] sm:$0xff]  ;;  %v573_v8 = vpack.c.bf16 %v97_v5, %v95_v3  ;;  %v99_v10 = vld [vmem:[#allocation2 + $0x20] sm:$0xff]  ;;  %v101_v11 = vld [vmem:[#allocation2 + $0x30] sm:$0xff]  ;;  %s525_s23 = sshll.u32 %s792_s22, 4  ;;  %s526_s23 = int_to_ptr.vmem [resolvable:$true] %s525_s23 }
  0x29   :  { %v575_v9 = vpack.c.bf16 %v102_v7, %v100_v6  ;;  %v64_v12 = vld [vmem:[%s1088_s2 + $0x8] sm:$0xff]  ;;  %572 = vmatprep.subr.bf16.mxu0 %v571_v4  ;;  %v66_v13 = vld [vmem:[%s1088_s2 + $0x18] sm:$0xff]  ;;  %v577_v14 = vpack.c.bf16 %v101_v11, %v99_v10  ;;  %v63_v16 = vld [vmem:[%s1088_s2] sm:$0xff]  ;;  %s763_s24 = scalar_lea.vmem %s526_s23, 32  ;;  %p764_p3 = scmp.lt.s32.totalorder %s526_s23, %s526_s23 }
  0x2a   :  { %574 = vmatpush1.bf16.msra.mxu0 %v573_v8  ;;  %v579_v15 = vpack.c.bf16 %v66_v13, %v64_v12  ;;  %v65_v17 = vld [vmem:[%s1088_s2 + $0x10] sm:$0xff]  ;;  %v68_v18 = vld [vmem:[%s1088_s2 + $0x28] sm:$0xff]  ;;  %v70_v19 = vld [vmem:[%s1088_s2 + $0x38] sm:$0xff] }
  0x2b   :  { %576 = vmatprep.subr.bf16.mxu0 %v575_v9  ;;  %v62_v20 = vld [vmem:[%s1087_s1] sm:$0x1]  ;;  %v581_v21 = vpack.c.bf16 %v65_v17, %v63_v16  ;;  %v583_v22 = vpack.c.bf16 %v70_v19, %v68_v18  ;;  %v69_v24 = vld [vmem:[%s1088_s2 + $0x30] sm:$0xff]  ;;  %v72_v25 = vld [vmem:[%s1088_s2 + $0x48] sm:$0xff] }
  0x2c   :  { %v67_v23 = vld [vmem:[%s1088_s2 + $0x20] sm:$0xff]  ;;  %v74_v26 = vld [vmem:[%s1088_s2 + $0x58] sm:$0xff]  ;;  %v73_v30 = vld [vmem:[%s1088_s2 + $0x50] sm:$0xff] }
  0x2d   :  { %v585_v27 = vpack.c.bf16 %v69_v24, %v67_v23  ;;  %v71_v28 = vld [vmem:[%s1088_s2 + $0x40] sm:$0xff]  ;;  %v587_v29 = vpack.c.bf16 %v74_v26, %v72_v25  ;;  %v76_v31 = vld [vmem:[%s1088_s2 + $0x68] sm:$0xff]  ;;  %v78_v32 = vld [vmem:[%s1088_s2 + $0x78] sm:$0xff] }
  0x2e   :  { %578 = vmatpush1.bf16.msra.mxu0 %v577_v14  ;;  %v266_v33 = vld [vmem:[#allocation5 + $0x8] sm:$0xff]  ;;  %v268_v34 = vld [vmem:[#allocation5 + $0x18] sm:$0xff]  ;;  %v265_v35 = vld [vmem:[#allocation5] sm:$0xff]  ;;  %v589_v40 = vpack.c.bf16 %v73_v30, %v71_v28  ;;  %v591_v46 = vpack.c.bf16 %v78_v32, %v76_v31 }
  0x2f   :  { %580 = vmatprep.subr.bf16.mxu0 %v579_v15  ;;  %v611_v36 = vpack.c.bf16 %v268_v34, %v266_v33  ;;  %v267_v37 = vld [vmem:[#allocation5 + $0x10] sm:$0xff]  ;;  %v270_v38 = vld [vmem:[#allocation5 + $0x28] sm:$0xff]  ;;  %v272_v39 = vld [vmem:[#allocation5 + $0x38] sm:$0xff] }
  0x30   :  { %v613_v41 = vpack.c.bf16 %v267_v37, %v265_v35  ;;  %v615_v42 = vpack.c.bf16 %v272_v39, %v270_v38  ;;  %v269_v43 = vld [vmem:[#allocation5 + $0x20] sm:$0xff]  ;;  %v271_v44 = vld [vmem:[#allocation5 + $0x30] sm:$0xff]  ;;  %v274_v45 = vld [vmem:[#allocation5 + $0x48] sm:$0xff] }
  0x31   :  { %535 = vmatmul.mubr.msk.f32.vlgmr.msra.gmra.mrb[0].mxu0 %vm103_vm0, %v62_v20  ;;  %v75_v47 = vld [vmem:[%s1088_s2 + $0x60] sm:$0xff]  ;;  %v77_v48 = vld [vmem:[%s1088_s2 + $0x70] sm:$0xff]  ;;  %612 = vmatprep.subr.bf16.mxu1 %v611_v36  ;;  %v276_v49 = vld [vmem:[#allocation5 + $0x58] sm:$0xff]  ;;  %v617_v52 = vpack.c.bf16 %v271_v44, %v269_v43 }
  0x32   :  { %582 = vmatpush1.bf16.msra.mxu0 %v581_v21  ;;  %242 = vmatprep.mubr.f32.mxu0 %v791_v0  ;;  %v80_v50 = vld [vmem:[%s1088_s2 + $0x88] sm:$0xff]  ;;  %v82_v51 = vld [vmem:[%s1088_s2 + $0x98] sm:$0xff]  ;;  %v619_v53 = vpack.c.bf16 %v276_v49, %v274_v45  ;;  %v273_v54 = vld [vmem:[#allocation5 + $0x40] sm:$0xff]  ;;  %v593_v56 = vpack.c.bf16 %v77_v48, %v75_v47 }
  0x33   :  { %584 = vmatprep.subr.bf16.mxu0 %v583_v22  ;;  %614 = vmatpush1.bf16.msra.mxu1 %v613_v41  ;;  %v275_v55 = vld [vmem:[#allocation5 + $0x50] sm:$0xff]  ;;  %v278_v57 = vld [vmem:[#allocation5 + $0x68] sm:$0xff]  ;;  %v280_v58 = vld [vmem:[#allocation5 + $0x78] sm:$0xff]  ;;  %v595_v59 = vpack.c.bf16 %v82_v51, %v80_v50 }
  0x34   :  { %616 = vmatprep.subr.bf16.mxu1 %v615_v42  ;;  %v79_v60 = vld [vmem:[%s1088_s2 + $0x80] sm:$0xff]  ;;  %v81_v61 = vld [vmem:[%s1088_s2 + $0x90] sm:$0xff]  ;;  %v84_v62 = vld [vmem:[%s1088_s2 + $0xa8] sm:$0xff]  ;;  %v621_v0 = vpack.c.bf16 %v275_v55, %v273_v54  ;;  %v623_v1 = vpack.c.bf16 %v280_v58, %v278_v57 }
  0x35   :  { %v86_v63 = vld [vmem:[%s1088_s2 + $0xb8] sm:$0xff]  ;;  %v277_v2 = vld [vmem:[#allocation5 + $0x60] sm:$0xff]  ;;  %v279_v3 = vld [vmem:[#allocation5 + $0x70] sm:$0xff]  ;;  %v597_v4 = vpack.c.bf16 %v81_v61, %v79_v60 }
  0x36   :  { %586 = vmatpush1.bf16.msra.mxu0 %v585_v27  ;;  %v282_v5 = vld [vmem:[#allocation5 + $0x88] sm:$0xff]  ;;  %v284_v6 = vld [vmem:[#allocation5 + $0x98] sm:$0xff]  ;;  %v599_v7 = vpack.c.bf16 %v86_v63, %v84_v62  ;;  %v83_v8 = vld [vmem:[%s1088_s2 + $0xa0] sm:$0xff]  ;;  %v625_v12 = vpack.c.bf16 %v279_v3, %v277_v2 }
  0x37   :  { %588 = vmatprep.subr.bf16.mxu0 %v587_v29  ;;  %618 = vmatpush1.bf16.msra.mxu1 %v617_v52  ;;  %v85_v9 = vld [vmem:[%s1088_s2 + $0xb0] sm:$0xff]  ;;  %v88_v10 = vld [vmem:[%s1088_s2 + $0xc8] sm:$0xff]  ;;  %v90_v11 = vld [vmem:[%s1088_s2 + $0xd8] sm:$0xff]  ;;  %v627_v13 = vpack.c.bf16 %v284_v6, %v282_v5 }
  0x38   :  { %620 = vmatprep.subr.bf16.mxu1 %v619_v53  ;;  %v281_v14 = vld [vmem:[#allocation5 + $0x80] sm:$0xff]  ;;  %v283_v15 = vld [vmem:[#allocation5 + $0x90] sm:$0xff]  ;;  %v601_v16 = vpack.c.bf16 %v85_v9, %v83_v8  ;;  %v286_v17 = vld [vmem:[#allocation5 + $0xa8] sm:$0xff]  ;;  %v603_v19 = vpack.c.bf16 %v90_v11, %v88_v10 }
  0x39   :  { %v288_v18 = vld [vmem:[#allocation5 + $0xb8] sm:$0xff]  ;;  %v87_v20 = vld [vmem:[%s1088_s2 + $0xc0] sm:$0xff]  ;;  %v89_v21 = vld [vmem:[%s1088_s2 + $0xd0] sm:$0xff]  ;;  %v629_v24 = vpack.c.bf16 %v283_v15, %v281_v14 }
  0x3a   :  { %590 = vmatpush1.bf16.msra.mxu0 %v589_v40  ;;  %v92_v22 = vld [vmem:[%s1088_s2 + $0xe8] sm:$0xff]  ;;  %v94_v23 = vld [vmem:[%s1088_s2 + $0xf8] sm:$0xff]  ;;  %v631_v25 = vpack.c.bf16 %v288_v18, %v286_v17  ;;  %v285_v26 = vld [vmem:[#allocation5 + $0xa0] sm:$0xff]  ;;  %v605_v28 = vpack.c.bf16 %v89_v21, %v87_v20 }
  0x3b   :  { %592 = vmatprep.subr.bf16.mxu0 %v591_v46  ;;  %622 = vmatpush1.bf16.msra.mxu1 %v621_v0  ;;  %v287_v27 = vld [vmem:[#allocation5 + $0xb0] sm:$0xff]  ;;  %v290_v29 = vld [vmem:[#allocation5 + $0xc8] sm:$0xff]  ;;  %v292_v30 = vld [vmem:[#allocation5 + $0xd8] sm:$0xff]  ;;  %v607_v31 = vpack.c.bf16 %v94_v23, %v92_v22 }
  0x3c   :  { %624 = vmatprep.subr.bf16.mxu1 %v623_v1  ;;  %v91_v32 = vld [vmem:[%s1088_s2 + $0xe0] sm:$0xff]  ;;  %v93_v33 = vld [vmem:[%s1088_s2 + $0xf0] sm:$0xff]  ;;  %v633_v34 = vpack.c.bf16 %v287_v27, %v285_v26  ;;  %v635_v35 = vpack.c.bf16 %v292_v30, %v290_v29  ;;  %v294_v39 = vld [vmem:[#allocation5 + $0xe8] sm:$0xff] }
  0x3d   :  { %v289_v36 = vld [vmem:[#allocation5 + $0xc0] sm:$0xff]  ;;  %v291_v37 = vld [vmem:[#allocation5 + $0xd0] sm:$0xff]  ;;  %v609_v38 = vpack.c.bf16 %v93_v33, %v91_v32  ;;  %v296_v40 = vld [vmem:[#allocation5 + $0xf8] sm:$0xff] }
  0x3e   :  { %594 = vmatpush1.bf16.msra.mxu0 %v593_v56  ;;  %v637_v41 = vpack.c.bf16 %v291_v37, %v289_v36  ;;  %v639_v42 = vpack.c.bf16 %v296_v40, %v294_v39  ;;  %v293_v43 = vld [vmem:[#allocation5 + $0xe0] sm:$0xff]  ;;  %v295_v44 = vld [vmem:[#allocation5 + $0xf0] sm:$0xff]  ;;  %v298_v46 = vld [vmem:[#allocation5 + $0x108] sm:$0xff] }
  0x3f   :  { %596 = vmatprep.subr.bf16.mxu0 %v595_v59  ;;  %626 = vmatpush1.bf16.msra.mxu1 %v625_v12  ;;  %v61_v45 = vld [vmem:[%s1086_s0] sm:$0x1]  ;;  %v300_v47 = vld [vmem:[#allocation5 + $0x118] sm:$0xff]  ;;  %v641_v48 = vpack.c.bf16 %v295_v44, %v293_v43  ;;  %v299_v51 = vld [vmem:[#allocation5 + $0x110] sm:$0xff] }
  0x40   :  { %628 = vmatprep.subr.bf16.mxu1 %v627_v13  ;;  %v643_v49 = vpack.c.bf16 %v300_v47, %v298_v46  ;;  %v297_v50 = vld [vmem:[#allocation5 + $0x100] sm:$0xff]  ;;  %v302_v52 = vld [vmem:[#allocation5 + $0x128] sm:$0xff]  ;;  %v304_v53 = vld [vmem:[#allocation5 + $0x138] sm:$0xff] }
  0x41   :  { %v645_v54 = vpack.c.bf16 %v299_v51, %v297_v50  ;;  %v647_v55 = vpack.c.bf16 %v304_v53, %v302_v52  ;;  %v301_v56 = vld [vmem:[#allocation5 + $0x120] sm:$0xff]  ;;  %v303_v57 = vld [vmem:[#allocation5 + $0x130] sm:$0xff]  ;;  %v306_v58 = vld [vmem:[#allocation5 + $0x148] sm:$0xff] }
  0x42   :  { %598 = vmatpush1.bf16.msra.mxu0 %v597_v4  ;;  %v308_v59 = vld [vmem:[#allocation5 + $0x158] sm:$0xff]  ;;  %v649_v60 = vpack.c.bf16 %v303_v57, %v301_v56  ;;  %v305_v62 = vld [vmem:[#allocation5 + $0x140] sm:$0xff]  ;;  %v307_v63 = vld [vmem:[#allocation5 + $0x150] sm:$0xff] }
  0x43   :  { %600 = vmatprep.subr.bf16.mxu0 %v599_v7  ;;  %630 = vmatpush1.bf16.msra.mxu1 %v629_v24  ;;  %v651_v61 = vpack.c.bf16 %v308_v59, %v306_v58  ;;  %v310_v0 = vld [vmem:[#allocation5 + $0x168] sm:$0xff]  ;;  %v312_v1 = vld [vmem:[#allocation5 + $0x178] sm:$0xff]  ;;  %v653_v2 = vpack.c.bf16 %v307_v63, %v305_v62  ;;  %v309_v4 = vld [vmem:[#allocation5 + $0x160] sm:$0xff] }
  0x44   :  { %632 = vmatprep.subr.bf16.mxu1 %v631_v25  ;;  %v655_v3 = vpack.c.bf16 %v312_v1, %v310_v0  ;;  %v311_v5 = vld [vmem:[#allocation5 + $0x170] sm:$0xff]  ;;  %v314_v6 = vld [vmem:[#allocation5 + $0x188] sm:$0xff]  ;;  %v316_v7 = vld [vmem:[#allocation5 + $0x198] sm:$0xff] }
  0x45   :  { %v657_v8 = vpack.c.bf16 %v311_v5, %v309_v4  ;;  %v659_v9 = vpack.c.bf16 %v316_v7, %v314_v6  ;;  %v313_v10 = vld [vmem:[#allocation5 + $0x180] sm:$0xff]  ;;  %v315_v11 = vld [vmem:[#allocation5 + $0x190] sm:$0xff]  ;;  %v318_v12 = vld [vmem:[#allocation5 + $0x1a8] sm:$0xff]  ;;  %v251_v6 = vlaneseq }
  0x46   :  { %602 = vmatpush1.bf16.msra.mxu0 %v601_v16  ;;  %v320_v13 = vld [vmem:[#allocation5 + $0x1b8] sm:$0xff]  ;;  %v661_v14 = vpack.c.bf16 %v315_v11, %v313_v10  ;;  %v317_v16 = vld [vmem:[#allocation5 + $0x1a0] sm:$0xff]  ;;  %v319_v17 = vld [vmem:[#allocation5 + $0x1b0] sm:$0xff] }
  0x47   :  { %604 = vmatprep.subr.bf16.mxu0 %v603_v19  ;;  %634 = vmatpush1.bf16.msra.mxu1 %v633_v34  ;;  %v663_v15 = vpack.c.bf16 %v320_v13, %v318_v12  ;;  %v322_v18 = vld [vmem:[#allocation5 + $0x1c8] sm:$0xff]  ;;  %v324_v19 = vld [vmem:[#allocation5 + $0x1d8] sm:$0xff]  ;;  %v665_v20 = vpack.c.bf16 %v319_v17, %v317_v16  ;;  %v321_v22 = vld [vmem:[#allocation5 + $0x1c0] sm:$0xff]  ;;  %v252_v7 = vshrl.u32 %v251_v6, 7 }
  0x48   :  { %636 = vmatprep.subr.bf16.mxu1 %v635_v35  ;;  %v667_v21 = vpack.c.bf16 %v324_v19, %v322_v18  ;;  %v323_v23 = vld [vmem:[#allocation5 + $0x1d0] sm:$0xff]  ;;  %v326_v25 = vld [vmem:[#allocation5 + $0x1e8] sm:$0xff]  ;;  %v328_v26 = vld [vmem:[#allocation5 + $0x1f8] sm:$0xff] }
  0x49   :  { %v669_v24 = vpack.c.bf16 %v323_v23, %v321_v22  ;;  %v671_v27 = vpack.c.bf16 %v328_v26, %v326_v25  ;;  %v327_v29 = vld [vmem:[#allocation5 + $0x1f0] sm:$0xff]  ;;  %v431_v32 = vld [vmem:[%s1093_s7 + $0x88] sm:$0xff]  ;;  %v414_v33 = vld [vmem:[%s1093_s7] sm:$0xff]  ;;  %v257_v10 = vsub.s32 1, %v252_v7 }
  0x4a   :  { %606 = vmatpush1.bf16.msra.mxu0 %v605_v28  ;;  %v325_v28 = vld [vmem:[#allocation5 + $0x1e0] sm:$0xff]  ;;  %v415_v35 = vld [vmem:[%s1093_s7 + $0x8] sm:$0xff]  ;;  %v432_v36 = vld [vmem:[%s1093_s7 + $0x90] sm:$0xff] }
  0x4b   :  { %608 = vmatprep.subr.bf16.mxu0 %v607_v31  ;;  %638 = vmatpush1.bf16.msra.mxu1 %v637_v41  ;;  %v673_v30 = vpack.c.bf16 %v327_v29, %v325_v28  ;;  %v430_v31 = vld [vmem:[%s1093_s7 + $0x80] sm:$0xff]  ;;  %v433_v37 = vld [vmem:[%s1093_s7 + $0x98] sm:$0xff]  ;;  %v416_v40 = vld [vmem:[%s1093_s7 + $0x10] sm:$0xff] }
  0x4c   :  { %640 = vmatprep.subr.bf16.mxu1 %v639_v42  ;;  %v675_v34 = vpack.c.bf16 %v431_v32, %v430_v31  ;;  %v679_v39 = vpack.c.bf16 %v433_v37, %v432_v36  ;;  %v417_v41 = vld [vmem:[%s1093_s7 + $0x18] sm:$0xff]  ;;  %v434_v42 = vld [vmem:[%s1093_s7 + $0xa0] sm:$0xff]  ;;  %v435_v43 = vld [vmem:[%s1093_s7 + $0xa8] sm:$0xff] }
  0x4d   :  { %v681_v44 = vpack.c.bf16 %v417_v41, %v416_v40  ;;  %v418_v46 = vld [vmem:[%s1093_s7 + $0x20] sm:$0xff]  ;;  %v419_v47 = vld [vmem:[%s1093_s7 + $0x28] sm:$0xff]  ;;  %v420_v52 = vld [vmem:[%s1093_s7 + $0x30] sm:$0xff] }
  0x4e   :  { %610 = vmatpush1.bf16.msra.mxu0 %v609_v38  ;;  %v677_v38 = vpack.c.bf16 %v415_v35, %v414_v33  ;;  %v685_v50 = vpack.c.bf16 %v419_v47, %v418_v46  ;;  %v421_v53 = vld [vmem:[%s1093_s7 + $0x38] sm:$0xff]  ;;  %v422_v58 = vld [vmem:[%s1093_s7 + $0x40] sm:$0xff]  ;;  %v423_v59 = vld [vmem:[%s1093_s7 + $0x48] sm:$0xff] }
  0x4f   :  { %642 = vmatpush1.bf16.msra.mxu1 %v641_v48  ;;  %676 = vmatprep.subr.bf16.mxu0 %v675_v34  ;;  %v436_v48 = vld [vmem:[%s1093_s7 + $0xb0] sm:$0xff]  ;;  %v689_v56 = vpack.c.bf16 %v421_v53, %v420_v52  ;;  %v693_v62 = vpack.c.bf16 %v423_v59, %v422_v58  ;;  %v425_v1 = vld [vmem:[%s1093_s7 + $0x58] sm:$0xff]  ;;  %v426_v19 = vld [vmem:[%s1093_s7 + $0x60] sm:$0xff] }
  0x50   :  { %644 = vmatprep.subr.bf16.mxu1 %v643_v49  ;;  %v437_v49 = vld [vmem:[%s1093_s7 + $0xb8] sm:$0xff]  ;;  %v424_v0 = vld [vmem:[%s1093_s7 + $0x50] sm:$0xff]  ;;  %v329_v28 = vld [vmem:[%s1092_s6] sm:$0x3]  ;;  %s759_s6 = scalar_lea.vmem %s526_s23, 16 }
  0x51   :  { %243 = vmatmul.mubr.f32.vlgmr.msra.gmra.mrb[0].mxu0 %v61_v45  ;;  %v683_v45 = vpack.c.bf16 %v435_v43, %v434_v42  ;;  %v687_v51 = vpack.c.bf16 %v437_v49, %v436_v48  ;;  %v697_v4 = vpack.c.bf16 %v425_v1, %v424_v0  ;;  %v444_v22 = vld [vmem:[%s1093_s7 + $0xf0] sm:$0xff]  ;;  %v445_v23 = vld [vmem:[%s1093_s7 + $0xf8] sm:$0xff]  ;;  %p760_p2 = scmp.ne.s32.totalorder %s526_s23, %s759_s6  ;;  %p765_p4 = scmp.lt.s32.totalorder %s763_s24, %s759_s6 }
  0x52   :  { %678 = vmatpush3.bf16.msra.mxu0 %v677_v38  ;;  %v428_v25 = vld [vmem:[%s1093_s7 + $0x70] sm:$0xff]  ;;  %v429_v26 = vld [vmem:[%s1093_s7 + $0x78] sm:$0xff]  ;;  %v446_v38 = vld [vmem:[%s1094_s8] sm:$0x1] }
  0x53   :  { %646 = vmatpush1.bf16.msra.mxu1 %v645_v54  ;;  %680 = vmatprep.subr.bf16.mxu0 %v679_v39  ;;  %v438_v54 = vld [vmem:[%s1093_s7 + $0xc0] sm:$0xff]  ;;  %p766_p5 = por %p765_p4, %p764_p3 }
  0x54   :  { %648 = vmatprep.subr.bf16.mxu1 %v647_v55  ;;  %v439_v55 = vld [vmem:[%s1093_s7 + $0xc8] sm:$0xff] }
  0x55   :  { %v691_v57 = vpack.c.bf16 %v439_v55, %v438_v54  ;;  %p767_p6 = pnand %p766_p5, %p760_p2 }
  0x56   :  { %682 = vmatpush3.bf16.msra.mxu0 %v681_v44 }
  0x57   :  { %650 = vmatpush1.bf16.msra.mxu1 %v649_v60  ;;  %684 = vmatprep.subr.bf16.mxu0 %v683_v45  ;;  %v440_v60 = vld [vmem:[%s1093_s7 + $0xd0] sm:$0xff] }
  0x58   :  { %652 = vmatprep.subr.bf16.mxu1 %v651_v61  ;;  %v441_v61 = vld [vmem:[%s1093_s7 + $0xd8] sm:$0xff] }
  0x59   :  { %v695_v63 = vpack.c.bf16 %v441_v61, %v440_v60 }
  0x5a   :  { %686 = vmatpush3.bf16.msra.mxu0 %v685_v50 }
  0x5b   :  { %654 = vmatpush1.bf16.msra.mxu1 %v653_v2  ;;  %688 = vmatprep.subr.bf16.mxu0 %v687_v51  ;;  %v442_v2 = vld [vmem:[%s1093_s7 + $0xe0] sm:$0xff] }
  0x5c   :  { %656 = vmatprep.subr.bf16.mxu1 %v655_v3  ;;  %v443_v3 = vld [vmem:[%s1093_s7 + $0xe8] sm:$0xff] }
  0x5d   :  { %v699_v5 = vpack.c.bf16 %v443_v3, %v442_v2 }
  0x5e   :  { %690 = vmatpush3.bf16.msra.mxu0 %v689_v56 }
  0x5f   :  { %658 = vmatpush1.bf16.msra.mxu1 %v657_v8  ;;  %692 = vmatprep.subr.bf16.mxu0 %v691_v57  ;;  %v253_v8 = vsub.s32 0, %v252_v7 }
  0x60   :  { %660 = vmatprep.subr.bf16.mxu1 %v659_v9  ;;  %v249_v9 = vld [vmem:[%s1090_s4] sm:$0x3] }
  0x61   :  { %v254_v11 = vrot.slane %v249_v9, %v253_v8  ;;  %v258_v12 = vrot.slane %v249_v9, %v257_v10  ;;  %v334_v29 = vrot.slane %v329_v28, %v253_v8 }
  0x62   :  { %694 = vmatpush3.bf16.msra.mxu0 %v693_v62 }
  0x63   :  { %662 = vmatpush1.bf16.msra.mxu1 %v661_v14  ;;  %696 = vmatprep.subr.bf16.mxu0 %v695_v63 }
  0x64   :  { %664 = vmatprep.subr.bf16.mxu1 %v663_v15 }
  0x66   :  { %698 = vmatpush3.bf16.msra.mxu0 %v697_v4 }
  0x67   :  { %666 = vmatpush1.bf16.msra.mxu1 %v665_v20  ;;  %700 = vmatprep.subr.bf16.mxu0 %v699_v5  ;;  %v427_v20 = vld [vmem:[%s1093_s7 + $0x68] sm:$0xff] }
  0x68   :  { %668 = vmatprep.subr.bf16.mxu1 %v667_v21  ;;  %v701_v21 = vpack.c.bf16 %v427_v20, %v426_v19 }
  0x6a   :  { %702 = vmatpush3.bf16.msra.mxu0 %v701_v21 }
  0x6b   :  { %670 = vmatpush1.bf16.msra.mxu1 %v669_v24  ;;  %v703_v24 = vpack.c.bf16 %v445_v23, %v444_v22 }
  0x6c   :  { %672 = vmatprep.subr.bf16.mxu1 %v671_v27  ;;  %v705_v27 = vpack.c.bf16 %v429_v26, %v428_v25 }
  0x6d   :  { %704 = vmatprep.subr.bf16.mxu0 %v703_v24 }
  0x6e   :  { %706 = vmatpush3.bf16.msra.mxu0 %v705_v27 }
  0x6f   :  { %674 = vmatpush1.bf16.msra.mxu1 %v673_v30  ;;  %v338_v30 = vrot.slane %v329_v28, %v257_v10 }
 0x124   :  { %v244_v13 = vpop.f32.mrb[0].mxu0 }
 0x125   :  { %v261_v14 = vadd.f32 %v254_v11, %v244_v13  ;;  %v246_v15 = vpop.f32.mrb[1].mxu0 }
 0x126   :  { %v262_v16 = vadd.f32 %v258_v12, %v246_v15 }
 0x127   :  { %v263_v18 = vmax.f32 %v261_v14, 0.0 }
 0x128   :  { %v264_v17 = vmax.f32 %v262_v16, 0.0 }
 0x12a   :  { %405 = vmatprep.mubr.f32.mxu1 %v264_v17 }
 0x12b   :  { %406 = vmatmul.mubr.f32.vlgmr.msra.gmra.mrb[0].mxu1 %v263_v18 }
 0x1fe   :  { %v407_v31 = vpop.f32.mrb[0].mxu1 }
 0x1ff   :  { %v408_v32 = vadd.f32 %v407_v31, %v334_v29  ;;  %v409_v33 = vpop.f32.mrb[1].mxu1 }
 0x200   :  { %v410_v34 = vadd.f32 %v409_v33, %v338_v30 }
 0x201   :  { %v412_v36 = vmax.f32 %v408_v32, 0.0 }
 0x202   :  { %v413_v35 = vmax.f32 %v410_v34, 0.0 }
 0x204   :  { %511 = vmatprep.mubr.f32.mxu0 %v413_v35 }
 0x205   :  { %512 = vmatmul.mubr.f32.vlgmr.msra.gmra.mrb[2].mxu0 %v412_v36 }
 0x2d8   :  { %v568_v37 = vpop.f32.mrb[2].mxu0 }
 0x2d9   :  { %v569_v39 = vpop.f32.mrb[3].mxu0 }
 0x2da   :  { %v570_v40 = vadd.f32 %v569_v39, %v568_v37 }
 0x2dc   :  { %v514_v41 = vadd.f32 %v570_v40, %v446_v38 }
 0x2de   :  { %518 = vst.msk [vmem:[#allocation7] sm:$0x1] %vm517_vm1, %v514_v41 }
 0x2df   :  { %770 = shalt.err (!%p767_p6)
}
 0x2e0   :  { %s771_s8 = scalar_lea.hbm %s1095_s9, 16 }
 0x2e1   :  { %p772_p7 = scmp.ne.s32.totalorder %s1095_s9, %s771_s8  ;;  %p775_p8 = scmp.lt.u32.totalorder %s771_s8, %s1095_s9 }
 0x2e3   :  { %p777_p9 = pnand %p775_p8, %p772_p7 }
 0x2e5   :  { %780 = shalt.err (!%p777_p9)
}
 0x2e6   :  { %528 = dma.vmem_to_hbm [thread:$0]  %s526_s23, 16, %s1095_s9, [#allocation4]  }
 0x2e7   :  { %785 = dma.done.wait [#allocation4], 16  }
 0x2e8   :  { %786 = vsyncadd [#allocation4], 4294967280 }
 0x2e9   :  { %532 = vsyncpa [#allocation3], 1 }
 0x2ea   :  { %533 = vsyncpa [#allocation6], 1 }
 0x2eb   :  { %534 = vsyncpa [#allocation4], 1 }

</bundles_post_ra>
